<compile_context>
chip_gen: v6e
topology: v6e:2x2x1
jax: 0.10.0
libtpu: 0.0.40
codegen_flags: <defaults>
</compile_context>

<pallas_src>
import functools

import jax
import jax.numpy as jnp
from jax.experimental import pallas as pl
from jax.experimental.pallas import tpu as pltpu

_MIB = 1024 * 1024


def _round_up(x, m):
    return ((x + m - 1) // m) * m


@functools.lru_cache(maxsize=1)
def _chip_profile():
    """Returns (vmem_cap, is_v7x, mxu_k_quantum, vmem_limit, vmem_budget).

    Conservative fallbacks if detection fails (assume the smallest VMEM)."""
    vmem_cap = None
    is_v7x = False
    mxu_q = 256
    try:
        kind = jax.devices()[0].device_kind.lower()
        if "v5" in kind:
            mxu_q = 128
            vmem_cap = 128 * _MIB
        elif "v6" in kind:
            vmem_cap = 128 * _MIB
        elif "7" in kind:
            is_v7x = True
            vmem_cap = 64 * _MIB
    except Exception:
        pass
    try:
        info = pltpu.get_tpu_info()
        cap = int(getattr(info, "vmem_capacity_bytes", 0))
        if cap > 0:
            vmem_cap = cap
            if cap <= 64 * _MIB:
                is_v7x = True
    except Exception:
        pass
    if vmem_cap is None:
        vmem_cap = 64 * _MIB  # conservative default: assume v7x-class VMEM
        is_v7x = True
    # Scoped-VMEM limit: leave headroom for Mosaic internal scratch/semaphores.
    vmem_limit = max(32 * _MIB, min(int(vmem_cap * 0.80), vmem_cap - 16 * _MIB))
    vmem_budget = int(vmem_limit * 0.80)  # tile-sizing budget (double-buffered)
    return vmem_cap, is_v7x, mxu_q, vmem_limit, vmem_budget


# ----------------------------------------------------------------------------
# Kernels
# ----------------------------------------------------------------------------
def _fc_kernel_single(x_ref, w_ref, b_ref, o_ref, *, apply_relu):
    """out = act(x @ W + b) for one (tm, tn) tile; full K strip resident."""
    acc = jnp.dot(x_ref[...], w_ref[...], preferred_element_type=jnp.float32)
    out = acc + b_ref[...]                       # (tm, tn) + (1, tn) broadcast
    if apply_relu:
        out = jnp.maximum(out, 0.0)
    o_ref[...] = out.astype(o_ref.dtype)


def _fc_kernel_ksplit(x_ref, w_ref, b_ref, o_ref, acc_ref, *, apply_relu):
    """K-split variant: (i, j, k) grid with an f32 VMEM accumulator."""
    k = pl.program_id(2)

    @pl.when(k == 0)
    def _():
        # Fold the bias into the accumulator instead of an epilogue add.
        acc_ref[...] = jnp.broadcast_to(b_ref[...], acc_ref.shape)

    acc_ref[...] += jnp.dot(
        x_ref[...], w_ref[...], preferred_element_type=jnp.float32
    )

    @pl.when(k == pl.num_programs(2) - 1)
    def _():
        out = acc_ref[...]
        if apply_relu:
            out = jnp.maximum(out, 0.0)
        o_ref[...] = out.astype(o_ref.dtype)


# ----------------------------------------------------------------------------
# Weight preparation (done ONCE, outside the per-call hot path)
# ----------------------------------------------------------------------------
def prepare_fc_weights(w_t, bias, compute_dtype=jnp.bfloat16):
    """Cast W to the MXU compute dtype and zero-pad W/bias to 128 multiples.

    Doing this once at init removes the per-forward re-read + re-write of the
    full weight (which otherwise roughly doubles weight HBM traffic)."""
    INC, OUTC = w_t.shape
    INC_pad = _round_up(INC, 128)
    OUTC_pad = _round_up(OUTC, 128)
    wc = w_t.astype(compute_dtype)
    if (INC_pad, OUTC_pad) != (INC, OUTC):
        wc = jnp.pad(wc, ((0, INC_pad - INC), (0, OUTC_pad - OUTC)))
    b2 = bias.astype(jnp.float32).reshape(1, OUTC)
    if OUTC_pad != OUTC:
        b2 = jnp.pad(b2, ((0, 0), (0, OUTC_pad - OUTC)))
    return {
        "w": wc,
        "b": b2,
        "inc": INC,
        "outc": OUTC,
        "compute_dtype": jnp.dtype(compute_dtype),
    }


# ----------------------------------------------------------------------------
# Forward
# ----------------------------------------------------------------------------
def fc_forward(
    x,
    params,
    *,
    apply_relu=True,
    tm=256,
    tn=512,
    tk_max=1024,
    use_ksplit=None,
):
    """x: (B, INC); params from prepare_fc_weights  ->  (B, OUTC) in x.dtype."""
    wc, b2 = params["w"], params["b"]
    INC, OUTC = params["inc"], params["outc"]
    cd = params["compute_dtype"]
    B, INC_x = x.shape
    assert INC_x == INC, "weight/input feature mismatch"
    out_dtype = x.dtype

    _, is_v7x, mxu_q, vmem_limit, vmem_budget = _chip_profile()

    INC_pad, OUTC_pad = wc.shape
    in_bytes = cd.itemsize
    out_bytes = jnp.dtype(out_dtype).itemsize
    sub = max(8, 32 // in_bytes)        # sublane quantum: 8 (f32) / 16 (bf16)

    # ---- tile selection ------------------------------------------------------
    tm_eff = _round_up(min(tm, _round_up(B, sub)), sub)
    # Largest 128-multiple <= tn that divides the pre-padded OUTC (weights are
    # already padded to a 128 multiple, so tn must divide it -- no re-padding).
    tn_cap = min(tn, OUTC_pad)
    tn_eff = 128
    for cand in range(tn_cap - tn_cap % 128, 127, -128):
        if OUTC_pad % cand == 0:
            tn_eff = cand
            break

    # v7x only (2 TensorCores/chip): prefer >= 2 parallel grid steps.
    if is_v7x and _round_up(B, tm_eff) == tm_eff and OUTC_pad == tn_eff:
        if tn_eff % 256 == 0:
            tn_eff //= 2
        elif tm_eff >= 2 * sub and tm_eff % (2 * sub) == 0:
            tm_eff //= 2

    B_pad = _round_up(B, tm_eff)

    bias_bytes = 2 * 8 * tn_eff * 4              # padded bias slab, negligible
    out_tile_bytes = 2 * tm_eff * tn_eff * out_bytes

    def _fits_single():
        fp = (2 * (tm_eff * INC_pad + INC_pad * tn_eff) * in_bytes
              + out_tile_bytes + bias_bytes)
        return fp <= vmem_budget

    if use_ksplit is None:
        use_ksplit = not _fits_single()

    tk_eff = None
    if use_ksplit:
        def _fp_k(tk_):
            # Double-buffered x and W strips + f32 accumulator scratch.
            return (2 * (tm_eff * tk_ + tk_ * tn_eff) * in_bytes
                    + out_tile_bytes + tm_eff * tn_eff * 4 + bias_bytes)

        def _pick_tk(q):
            cap = min(tk_max, INC_pad)
            for cand in range(cap - cap % q, q - 1, -q):
                if INC_pad % cand == 0 and _fp_k(cand) <= vmem_budget:
                    return cand
            return None

        # MXU-shaped K tiles: multiples of 256 on v6e/v7x, 128 on v5e; fall
        # back to 128 only when the budget / divisibility truly forces it.
        tk_eff = _pick_tk(mxu_q) or _pick_tk(128) or 128

    # ---- per-call x cast / pad (skipped when already aligned) ---------------
    xc = x if x.dtype == cd else x.astype(cd)
    if (B_pad, INC_pad) != (B, INC):
        xc = jnp.pad(xc, ((0, B_pad - B), (0, INC_pad - INC)))

    flops = 2 * B_pad * INC_pad * OUTC_pad
    bytes_acc = (B_pad * INC_pad * in_bytes
                 + INC_pad * OUTC_pad * in_bytes
                 + OUTC_pad * 4
                 + B_pad * OUTC_pad * out_bytes)
    cost = pl.CostEstimate(flops=flops, transcendentals=0,
                           bytes_accessed=bytes_acc)

    gi = B_pad // tm_eff
    gj = OUTC_pad // tn_eff

    if not use_ksplit:
        # Hold the LARGER operand resident across the inner grid axis so the
        # big one is read from HBM exactly once.
        x_total = B_pad * INC_pad * in_bytes
        w_total = INC_pad * OUTC_pad * in_bytes
        if w_total >= x_total:
            # W tile constant over inner axis (i): W HBM traffic = sizeof(W).
            grid = (gj, gi)
            x_spec = pl.BlockSpec((tm_eff, INC_pad), lambda j, i: (i, 0))
            w_spec = pl.BlockSpec((INC_pad, tn_eff), lambda j, i: (0, j))
            b_spec = pl.BlockSpec((1, tn_eff), lambda j, i: (0, j))
            o_spec = pl.BlockSpec((tm_eff, tn_eff), lambda j, i: (i, j))
        else:
            grid = (gi, gj)
            x_spec = pl.BlockSpec((tm_eff, INC_pad), lambda i, j: (i, 0))
            w_spec = pl.BlockSpec((INC_pad, tn_eff), lambda i, j: (0, j))
            b_spec = pl.BlockSpec((1, tn_eff), lambda i, j: (0, j))
            o_spec = pl.BlockSpec((tm_eff, tn_eff), lambda i, j: (i, j))

        out = pl.pallas_call(
            functools.partial(_fc_kernel_single, apply_relu=apply_relu),
            out_shape=jax.ShapeDtypeStruct((B_pad, OUTC_pad), out_dtype),
            grid_spec=pltpu.PrefetchScalarGridSpec(
                num_scalar_prefetch=0,
                grid=grid,
                in_specs=[x_spec, w_spec, b_spec],
                out_specs=o_spec,
            ),
            compiler_params=pltpu.CompilerParams(
                dimension_semantics=("parallel", "parallel"),
                vmem_limit_bytes=vmem_limit,
            ),
            cost_estimate=cost,
        )(xc, wc, b2)
    else:
        gk = INC_pad // tk_eff
        out = pl.pallas_call(
            functools.partial(_fc_kernel_ksplit, apply_relu=apply_relu),
            out_shape=jax.ShapeDtypeStruct((B_pad, OUTC_pad), out_dtype),
            grid_spec=pltpu.PrefetchScalarGridSpec(
                num_scalar_prefetch=0,
                grid=(gi, gj, gk),
                in_specs=[
                    pl.BlockSpec((tm_eff, tk_eff), lambda i, j, k: (i, k)),
                    pl.BlockSpec((tk_eff, tn_eff), lambda i, j, k: (k, j)),
                    pl.BlockSpec((1, tn_eff), lambda i, j, k: (0, j)),
                ],
                out_specs=pl.BlockSpec((tm_eff, tn_eff),
                                       lambda i, j, k: (i, j)),
                scratch_shapes=[pltpu.VMEM((tm_eff, tn_eff), jnp.float32)],
            ),
            compiler_params=pltpu.CompilerParams(
                dimension_semantics=("parallel", "parallel", "arbitrary"),
                vmem_limit_bytes=vmem_limit,
            ),
            cost_estimate=cost,
        )(xc, wc, b2)

    if (B_pad, OUTC_pad) != (B, OUTC):
        out = out[:B, :OUTC]
    return out


# ----------------------------------------------------------------------------
# Param init / reference
# ----------------------------------------------------------------------------
def init_fc_params(key, inc, outc):
    """Mirror the PyTorch module: kaiming_uniform_ weight (fan_in=inc,
       bound=sqrt(6/fan_in)), bias filled with 0 (batch_norm=False path)."""
    bound = (6.0 / inc) ** 0.5
    w = jax.random.uniform(key, (outc, inc), jnp.float32, -bound, bound)
    b = jnp.zeros((outc,), jnp.float32)
    return w.T, b        # pre-transpose to (INC, OUTC) for x @ W layout


def fc_reference(x, w_t, bias, apply_relu=True):
    out = x @ w_t + bias[None, :]
    if apply_relu:
        out = jnp.maximum(out, 0.0)
    return out


if __name__ == "__main__":
    key = jax.random.PRNGKey(0)
    kx, kw, kx2, kw2 = jax.random.split(key, 4)

    # 1) single-shot (no K grid axis) path, f32 compute: tight tolerance.
    B, INC, OUTC = 16, 32, 128
    x = jax.random.normal(kx, (B, INC), jnp.float32)
    w_t, bias = init_fc_params(kw, INC, OUTC)
    ref = fc_reference(x, w_t, bias)

    params_f32 = prepare_fc_weights(w_t, bias, compute_dtype=jnp.float32)
    out_f32 = jax.block_until_ready(fc_forward(x, params_f32))
    assert out_f32.shape == (B, OUTC)
    assert jnp.allclose(out_f32, ref, atol=1e-4, rtol=1e-4), "f32 path mismatch"

    # 2) default bf16 MXU path (f32 accumulation): looser tolerance.
    params_bf16 = prepare_fc_weights(w_t, bias)         # weights prepared once
    out_bf16 = jax.block_until_ready(fc_forward(x, params_bf16))
    assert out_bf16.shape == (B, OUTC)
    assert jnp.allclose(out_bf16, ref, atol=5e-2, rtol=5e-2), "bf16 path mismatch"

    # 3) K-split path (multiple reduction steps) + ragged / padded shapes.
    B2, INC2, OUTC2 = 10, 300, 200
    x2 = jax.random.normal(kx2, (B2, INC2), jnp.float32)
    w_t2, bias2 = init_fc_params(kw2, INC2, OUTC2)
    ref2 = fc_reference(x2, w_t2, bias2)
    params2 = prepare_fc_weights(w_t2, bias2, compute_dtype=jnp.float32)
    out2 = jax.block_until_ready(
        fc_forward(x2, params2, use_ksplit=True, tk_max=128))
    assert out2.shape == (B2, OUTC2)
    assert jnp.allclose(out2, ref2, atol=1e-4, rtol=1e-4), "k-split path mismatch"

    print("KERNEL_OK")
</pallas_src>

<mosaic_0001>
module attributes {stable_mosaic.version = 11 : i64} {
  func.func @_fc_kernel_single(%arg0: i32, %arg1: i32, %arg2: memref<8x128xf32, #tpu.memory_space<vmem>>, %arg3: memref<128x128xf32, #tpu.memory_space<vmem>>, %arg4: memref<1x128xf32, #tpu.memory_space<vmem>>, %arg5: memref<8x128xf32, #tpu.memory_space<vmem>>) attributes {dimension_semantics = [#tpu.dimension_semantics<parallel>, #tpu.dimension_semantics<parallel>], iteration_bounds = array<i64: 1, 2>, scalar_prefetch = 0 : i64, scratch_operands = 0 : i64, tpu.core_type = #tpu.core_type<tc>, window_params = [{transform_indices = @transform_0, window_bounds = array<i64: 8, 128>}, {transform_indices = @transform_1, window_bounds = array<i64: 128, 128>}, {transform_indices = @transform_2, window_bounds = array<i64: 1, 128>}, {transform_indices = @transform_3, window_bounds = array<i64: 8, 128>}]} {
    %c0 = arith.constant 0 : index
    %c0_0 = arith.constant 0 : index
    %0 = vector.load %arg2[%c0, %c0_0] : memref<8x128xf32, #tpu.memory_space<vmem>>, vector<8x128xf32>
    %c0_1 = arith.constant 0 : index
    %c0_2 = arith.constant 0 : index
    %1 = vector.load %arg3[%c0_1, %c0_2] : memref<128x128xf32, #tpu.memory_space<vmem>>, vector<128x128xf32>
    %cst = arith.constant dense<0.000000e+00> : vector<8x128xf32>
    %2 = tpu.matmul %0, %1, %cst {dimension_numbers = #tpu.dot_dimension_numbers<[1], [0], [0], [1], [0, 0, 1, 1], [], []>} : vector<8x128xf32>, vector<128x128xf32>, vector<8x128xf32> -> vector<8x128xf32>
    %c0_3 = arith.constant 0 : index
    %c0_4 = arith.constant 0 : index
    %3 = vector.load %arg4[%c0_3, %c0_4] : memref<1x128xf32, #tpu.memory_space<vmem>>, vector<1x128xf32>
    %4 = vector.broadcast %3 : vector<1x128xf32> to vector<8x128xf32>
    %5 = arith.addf %2, %4 : vector<8x128xf32>
    %cst_5 = arith.constant 0.000000e+00 : f32
    %6 = vector.broadcast %cst_5 : f32 to vector<8x128xf32>
    %7 = arith.maximumf %5, %6 : vector<8x128xf32>
    %c0_6 = arith.constant 0 : index
    %c0_7 = arith.constant 0 : index
    %8 = vector.load %arg5[%c0_6, %c0_7] : memref<8x128xf32, #tpu.memory_space<vmem>>, vector<8x128xf32>
    tpu.vector_store %arg5[%c0_6, %c0_7], %7 {strides = array<i32>} : memref<8x128xf32, #tpu.memory_space<vmem>>, vector<8x128xf32>,
    return
  }
  func.func @transform_0(%arg0: i32, %arg1: i32) -> (i32, i32) {
    %c0_i32 = arith.constant 0 : i32
    %c0_i32_0 = arith.constant 0 : i32
    return %arg1, %c0_i32 : i32, i32
  }
  func.func @transform_1(%arg0: i32, %arg1: i32) -> (i32, i32) {
    %c0_i32 = arith.constant 0 : i32
    %c0_i32_0 = arith.constant 0 : i32
    return %c0_i32, %arg0 : i32, i32
  }
  func.func @transform_2(%arg0: i32, %arg1: i32) -> (i32, i32) {
    %c0_i32 = arith.constant 0 : i32
    %c0_i32_0 = arith.constant 0 : i32
    return %c0_i32, %arg0 : i32, i32
  }
  func.func @transform_3(%arg0: i32, %arg1: i32) -> (i32, i32) {
    %c0_i32 = arith.constant 0 : i32
    return %arg1, %arg0 : i32, i32
  }
}

</mosaic_0001>

<bundles_post_ra>
// kernel: tpu_custom_call.1
= control target key start
LH: loop header
LB: loop body
LE: loop exit
PB: predicated region body
PF: predicated region fallthrough
CT: control target
= control target key end

     0   :  { %8 = vsyncpa [#allocation3], 0  ;;  %s940_s0 = inlined_call_operand.hbm [shape: f32[16,128], index: 0, kind: input, shape index: {}]   ;;  %s941_s1 = inlined_call_operand.hbm [shape: f32[128,128], index: 1, kind: input, shape index: {}]   ;;  %s942_s2 = inlined_call_operand.vmem [shape: f32[1,128], index: 2, kind: input, shape index: {}]   ;;  %s943_s3 = inlined_call_operand.hbm [shape: f32[16,128], index: 3, kind: output, shape index: {}]  }
   0x1   :  { %10 = vsyncpa [#allocation3 + $0x1], 0 }
   0x2   :  { %11 = vsyncpa [#allocation6], 0 }
   0x3   :  { %12 = vsyncpa [#allocation4], 0 }
   0x4   :  { %14 = vsyncpa [#allocation4 + $0x1], 0  ;;  %s763_s12 = smov 0   ;;  %s765_s13 = smov 0  }
   0x5   :  { %s767_s14 = smov 0   ;;  %s769_s15 = smov 0  }
   0x6   :  { %s771_s16 = smov 0   ;;  %s773_s17 = smov 0  }
   0x7 LB: > { %s450_s18 = sadd.s32 4294967295, %s734_s17   ;;  %s451_s19 = sadd.s32 4294967294, %s734_s17   ;;  %s734_s17 = sphi %s773_s17, %s20_s17   ;;  %s730_s16 = sphi %s771_s16, %s961_s16   ;;  %s726_s15 = sphi %s769_s15, %s960_s15   ;;  %s722_s14 = sphi %s767_s14, %s959_s14   ;;  %s718_s13 = sphi %s765_s13, %s958_s13   ;;  %s714_s12 = sphi %s763_s12, %s957_s12  }
   0x8   : > { %p52_p0 = scmp.ne.s32.totalorder %s718_s13, %s714_s12  ;;  %p797_p1 = scmp.eq.s32.totalorder %s450_s18, 0 }
   0x9   : > { %p801_p2 = scmp.eq.s32.totalorder %s450_s18, 1  ;;  %p136_p3 = scmp.eq.s32.totalorder %s451_s19, 1 }
   0xa   : > { %p807_p4 = por %p797_p1, %p52_p0  ;;  %p452_p5 = scmp.ge.s32.totalorder %s734_s17, 1 }
   0xb   : > { %p812_p6 = por %p136_p3, %p52_p0  ;;  %p143_p7 = scmp.lt.s32.totalorder %s734_s17, 3 }
   0xc   : > { %s947_s22 = scalar_select %p807_p4, 1, 0 }
   0xd   : > { %s948_s23 = scalar_select %p812_p6, 1, 0 }
   0xe   : > { %p817_p8 = pnand %p452_p5, %p143_p7  ;;  %s736_s25 = smov [#allocation5]  }
   0xf   : > { %s157_s26 = sshll.u32 %s736_s25, 4  ;;  %s29_s28 = sadd.s32 1, %s730_s16  ;;  %s158_s26 = int_to_ptr.vmem [resolvable:$true] %s157_s26 }
  0x10   : > { %p527_p9 = pneg %p817_p8  ;;  %s607_s29 = scalar_lea.vmem %s158_s26, 2048 }
  0x11   : > { %p608_p13 = scmp.ne.s32.totalorder %s158_s26, %s607_s29  ;;  %p615_p5 = scmp.lt.s32.totalorder %s158_s26, %s158_s26 }
  0x12   : > { %p826_p11 = pnand %p527_p9, %p797_p1  ;;  %p616_p7 = scmp.lt.s32.totalorder %s607_s29, %s607_s29 }
  0x14   : > { %p598_p12 = pneg %p826_p11  ;;  %p617_p6 = por %p616_p7, %p615_p5 }
  0x16   : > { %p610_p0 = pnand %p608_p13, %p598_p12 }
  0x18   : > { %p611_p3 = pneg %p610_p0 }
  0x1a   : > { %p618_p4 = pnand %p617_p6, %p611_p3 }
  0x1c   : > { %621 = shalt.err (!%p618_p4)
}
  0x1d   : > { %s737_s30 = smov 128   ;;  %s738_s4 = smov 8  }
  0x1e   : > { %530 = dma.hbm_to_vmem [thread:$0]  (!%p826_p11), %s941_s1, 2048, %s158_s26, [#allocation6], %s737_s30, %s737_s30, %s738_s4  }
  0x1f   : > { %p30_p6 = scmp.ge.s32.totalorder %s29_s28, 2  ;;  %s39_s7 = sadd.s32 1, %s722_s14 }
  0x20   : > { %p46_p4 = scmp.ne.s32.totalorder %s722_s14, %s718_s13  ;;  %p47_p9 = scmp.eq.s32.totalorder %s734_s17, 0 }
  0x21   : > { %s963_s28 = smov (%p30_p6, %s29_s28), 0  ;;  %p540_p0 = scmp.lt.s32.totalorder %s734_s17, 2 }
  0x22   : > { %p844_p12 = por %p47_p9, %p46_p4  ;;  %p850_p13 = por %p801_p2, %p46_p4 }
  0x23   : > { %s36_s10 = ssub.s32 %s730_s16, %s963_s28  ;;  %s177_s11 = sand.u32 1, %s722_s14  }
  0x24   : > { %p37_p11 = scmp.eq.s32.totalorder %s36_s10, 0  ;;  %s456_s18 = sshll.u32 %s177_s11, 3 }
  0x25   : > { %s457_s25 = sshll.u32 %s730_s16, 7  ;;  %s181_s30 = scalar_lea.vmem [#allocation2], %s456_s18 }
  0x26   : > { %s859_s19 = scalar_select %p37_p11, %s722_s14, %s39_s7  }
  0x27   : > { %s186_s29 = scalar_lea.hbm %s940_s0, %s457_s25  ;;  %s188_s4 = sshll.u32 %s181_s30, 4  ;;  %s189_s4 = int_to_ptr.vmem [resolvable:$true] %s188_s4 }
  0x28   : > { %p867_p2 = pnand %p540_p0, %p844_p12  ;;  %s178_s5 = scalar_lea.sflag [#allocation3], %s177_s11 }
  0x29   : > { %s635_s6 = scalar_lea.vmem %s189_s4, 128  ;;  %s739_s7 = smov [#allocation2]  }
  0x2a   : > { %p624_p3 = pneg %p867_p2  ;;  %p636_p5 = scmp.ne.s32.totalorder %s189_s4, %s635_s6 }
  0x2b   : > { %s640_s10 = sshll.u32 %s739_s7, 4  ;;  %s641_s10 = int_to_ptr.vmem [resolvable:$false] %s640_s10 }
  0x2c   : > { %p638_p7 = pnand %p636_p5, %p624_p3  ;;  %s642_s25 = scalar_lea.vmem %s641_s10, 256 }
  0x2d   : > { %p643_p4 = scmp.lt.s32.totalorder %s189_s4, %s641_s10  ;;  %p644_p9 = scmp.lt.s32.totalorder %s642_s25, %s635_s6 }
  0x2e   : > { %p639_p6 = pneg %p638_p7 }
  0x2f   : > { %p645_p11 = por %p644_p9, %p643_p4 }
  0x31   : > { %p646_p10 = pnand %p645_p11, %p639_p6 }
  0x33   : > { %649 = shalt.err (!%p646_p10)
}
  0x34   : > { %534 = dma.hbm_to_vmem [thread:$0]  (!%p867_p2), %s186_s29, 128, %s189_s4, %s178_s5  }
  0x35   : > { %197 = sbr.rel (%p817_p8) target bundleno = 304 (0x130), region = 32  ;;  %s878_s8 = sand.u32 (!%p817_p8), 1, %s718_s13  }
  0x36   : > { %s459_s11 = sshll.u32 (!%p817_p8), %s878_s8, 3  ;;  %s200_s18 = scalar_lea.sflag (!%p817_p8), [#allocation3], %s878_s8 }
  0x37   : > { %s884_s26 = scalar_lea.vmem (!%p817_p8), [#allocation2], %s459_s11  ;;  %p954_p12 = scmp.ne.s32.totalorder (!%p817_p8), %s947_s22, 0 }
  0x3a   : > { %701 = dma.done.wait (%p954_p12), %s200_s18, 128  }
  0x3b   : > { %703 = vsyncadd (%p954_p12), %s200_s18, 4294967168 }
  0x3c   : > { %705 = dma.done.wait (%p797_p1), [#allocation6], 2048  }
  0x3d   : > { %707 = vsyncadd (%p797_p1), [#allocation6], 4294965248  ;;  %v740_v0 = vmov 0.0   ;;  %vm741_vm0 = vmmov 0   ;;  %v252_v1 = vld [vmem:[#allocation5 + $0x78] sm:$0xff]  ;;  %v251_v2 = vld [vmem:[#allocation5 + $0x70] sm:$0xff] }
  0x3e   : > { %484 = vmatprep.subr.mxu0 %v740_v0  ;;  %516 = vmatprep.mubr.msk.f32.mxu0 %vm741_vm0, %v740_v0  ;;  %v250_v3 = vld [vmem:[#allocation5 + $0x68] sm:$0xff]  ;;  %v249_v4 = vld [vmem:[#allocation5 + $0x60] sm:$0xff]  ;;  %v248_v5 = vld [vmem:[#allocation5 + $0x58] sm:$0xff]  ;;  %s464_s24 = sshll.u32 %s726_s15, 7  ;;  %s232_s27 = scalar_lea.vmem [#allocation7], %s459_s11 }
  0x3f   : > { %485 = vmatpush3.msra.mxu0 %v252_v1  ;;  %v247_v6 = vld [vmem:[#allocation5 + $0x50] sm:$0xff]  ;;  %v246_v7 = vld [vmem:[#allocation5 + $0x48] sm:$0xff]  ;;  %v245_v8 = vld [vmem:[#allocation5 + $0x40] sm:$0xff]  ;;  %s347_s29 = sshll.u32 %s232_s27, 4  ;;  %s345_s21 = scalar_lea.hbm %s943_s3, %s464_s24  ;;  %s348_s29 = int_to_ptr.vmem [resolvable:$true] %s347_s29 }
  0x40   : > { %486 = vmatprep.subr.mxu0 %v740_v0  ;;  %v244_v9 = vld [vmem:[#allocation5 + $0x38] sm:$0xff]  ;;  %v243_v10 = vld [vmem:[#allocation5 + $0x30] sm:$0xff]  ;;  %v242_v11 = vld [vmem:[#allocation5 + $0x28] sm:$0xff]  ;;  %s333_s5 = scalar_lea.sflag [#allocation4], %s878_s8  ;;  %s650_s6 = scalar_lea.vmem %s348_s29, 128 }
  0x41   : > { %487 = vmatpush3.msra.mxu0 %v251_v2  ;;  %v241_v12 = vld [vmem:[#allocation5 + $0x20] sm:$0xff]  ;;  %v240_v13 = vld [vmem:[#allocation5 + $0x18] sm:$0xff]  ;;  %v239_v14 = vld [vmem:[#allocation5 + $0x10] sm:$0xff]  ;;  %p651_p1 = scmp.ne.s32.totalorder %s348_s29, %s650_s6  ;;  %s742_s7 = smov [#allocation7]  }
  0x42   : > { %488 = vmatprep.subr.mxu0 %v740_v0  ;;  %v238_v15 = vld [vmem:[#allocation5 + $0x8] sm:$0xff]  ;;  %v237_v16 = vld [vmem:[#allocation5] sm:$0xff]  ;;  %v236_v17 = vld [vmem:[%s884_s26] sm:$0xff]  ;;  %s654_s15 = sshll.u32 %s742_s7, 4  ;;  %s655_s15 = int_to_ptr.vmem [resolvable:$false] %s654_s15 }
  0x43   : > { %489 = vmatpush3.msra.mxu0 %v250_v3  ;;  %v462_v18 = vld [vmem:[%s942_s2] ss:$0 sm:$0xff]  ;;  %p652_p8 = pnand %p651_p1, %p850_p13  ;;  %s656_s10 = scalar_lea.vmem %s655_s15, 256 }
  0x44   : > { %490 = vmatprep.subr.mxu0 %v740_v0  ;;  %p657_p0 = scmp.lt.s32.totalorder %s348_s29, %s655_s15  ;;  %p658_p2 = scmp.lt.s32.totalorder %s656_s10, %s650_s6 }
  0x45   : > { %491 = vmatpush3.msra.mxu0 %v249_v4  ;;  %p653_p10 = pneg %p652_p8 }
  0x46   : > { %492 = vmatprep.subr.mxu0 %v740_v0  ;;  %p659_p3 = por %p658_p2, %p657_p0 }
  0x47   : > { %493 = vmatpush3.msra.mxu0 %v248_v5 }
  0x48   : > { %494 = vmatprep.subr.mxu0 %v740_v0  ;;  %p660_p5 = pnand %p659_p3, %p653_p10 }
  0x49   : > { %495 = vmatpush3.msra.mxu0 %v247_v6 }
  0x4a   : > { %496 = vmatprep.subr.mxu0 %v740_v0 }
  0x4b   : > { %497 = vmatpush3.msra.mxu0 %v246_v7 }
  0x4c   : > { %498 = vmatprep.subr.mxu0 %v740_v0 }
  0x4d   : > { %499 = vmatpush3.msra.mxu0 %v245_v8 }
  0x4e   : > { %500 = vmatprep.subr.mxu0 %v740_v0 }
  0x4f   : > { %501 = vmatpush3.msra.mxu0 %v244_v9 }
  0x50   : > { %502 = vmatprep.subr.mxu0 %v740_v0 }
  0x51   : > { %503 = vmatpush3.msra.mxu0 %v243_v10 }
  0x52   : > { %504 = vmatprep.subr.mxu0 %v740_v0 }
  0x53   : > { %505 = vmatpush3.msra.mxu0 %v242_v11 }
  0x54   : > { %506 = vmatprep.subr.mxu0 %v740_v0 }
  0x55   : > { %507 = vmatpush3.msra.mxu0 %v241_v12 }
  0x56   : > { %508 = vmatprep.subr.mxu0 %v740_v0 }
  0x57   : > { %509 = vmatpush3.msra.mxu0 %v240_v13 }
  0x58   : > { %510 = vmatprep.subr.mxu0 %v740_v0 }
  0x59   : > { %511 = vmatpush3.msra.mxu0 %v239_v14 }
  0x5a   : > { %512 = vmatprep.subr.mxu0 %v740_v0 }
  0x5b   : > { %513 = vmatpush3.msra.mxu0 %v238_v15 }
  0x5c   : > { %514 = vmatprep.subr.mxu0 %v740_v0 }
  0x5d   : > { %515 = vmatpush3.msra.mxu0 %v237_v16 }
  0x5e   : > { %517 = vmatmul.mubr.f32.vlgmr.msra.gmra.mxu0 %v236_v17 }
 0x11e   : > { %v326_v19 = vpop.f32.mrf.mxu0 }
 0x11f   : > { %v327_v20 = vadd.f32 %v462_v18, %v326_v19 }
 0x120   : > { %v518_v21 = vpop.f32.mrf.mxu0 }
 0x121   : > { %v330_v22 = vmax.f32 %v327_v20, 0.0 }
 0x123   : > { %331 = vst [vmem:[%s232_s27] sm:$0xff] %v330_v22 }
 0x124   : > { %663 = shalt.err (!%p660_p5)
}
 0x125   : > { %s664_s25 = scalar_lea.hbm %s345_s21, 128  ;;  %s668_s18 = scalar_lea.hbm %s943_s3, 256 }
 0x126   : > { %p665_p7 = scmp.ne.s32.totalorder %s345_s21, %s664_s25  ;;  %p669_p9 = scmp.lt.s32.totalorder %s345_s21, %s943_s3 }
 0x127   : > { %p670_p11 = scmp.lt.s32.totalorder %s668_s18, %s664_s25 }
 0x128   : > { %p666_p6 = pnand %p665_p7, %p850_p13 }
 0x129   : > { %p671_p12 = por %p670_p11, %p669_p9 }
 0x12a   : > { %p667_p4 = pneg %p666_p6 }
 0x12c   : > { %p672_p1 = pnand %p671_p12, %p667_p4 }
 0x12e   : > { %675 = shalt.err (!%p672_p1)
}
 0x12f   : > { %525 = dma.vmem_to_hbm [thread:$0]  (%p850_p13), %s348_s29, 128, %s345_s21, %s333_s5  }
 0x130 PF: > { %s359_s22 = sand.u32 1, %s714_s12   ;;  %p955_p8 = scmp.ne.s32.totalorder %s948_s23, 0 }
 0x131   : > { %p956_p10 = scmp.ge.s32.totalorder %s734_s17, 2  ;;  %s360_s24 = scalar_lea.sflag [#allocation4], %s359_s22 }
 0x133   : > { %p536_p0 = pnand %p956_p10, %p955_p8 }
 0x135   : > { %p537_p2 = pneg %p536_p0 }
 0x137   : > { %709 = dma.done.wait (%p537_p2), %s360_s24, 128  }
 0x138   : > { %711 = vsyncadd (%p537_p2), %s360_s24, 4294967168  ;;  %s20_s17 = sadd.s32 1, %s734_s17   ;;  %s957_s12 = smov %s718_s13 }
 0x139   : > { %p17_p3 = scmp.ge.s32.totalorder %s20_s17, 4   ;;  %s958_s13 = smov %s722_s14 }
 0x13a   : > { %s959_s14 = smov %s859_s19  ;;  %s960_s15 = smov %s730_s16 }
 0x13b   : > { %s961_s16 = smov %s963_s28  ;;  %19 = sbr.rel (!%p17_p3) target bundleno = 7 (0x7), region = 85 }
 0x140   :  { %365 = vsyncpa [#allocation3], 1 }
 0x141   :  { %367 = vsyncpa [#allocation3 + $0x1], 1 }
 0x142   :  { %368 = vsyncpa [#allocation6], 1 }
 0x143   :  { %369 = vsyncpa [#allocation4], 1 }
 0x144   :  { %371 = vsyncpa [#allocation4 + $0x1], 1 }

</bundles_post_ra>
